<compile_context>
chip_gen: v7x
topology: tpu7x:2x2x1
jax: 0.10.0
libtpu: 0.0.40
codegen_flags: <defaults>
</compile_context>

<pallas_src>
import jax
import jax.numpy as jnp
from jax import lax
from jax.experimental import pallas as pl
from jax.experimental.pallas import tpu as pltpu  # noqa: F401  (TPU backend)

# Problem sizes (small, consistent with an image-classifier forward)
B, C, H, W = 2, 4, 16, 16
F = 8                 # conv output channels per sub-model
KH = KW = 3
HW = H * W            # 256  (= 2 lane tiles -> pooling segments are lane-aligned)
BHW = B * HW          # 512
KC = KH * KW * C      # 36   (im2col patch width)
KC1 = KC + 1          # 37   (extra ones row folds conv bias into the matmul)
F2 = 2 * F            # 16   (both heads fused)


def _combined_kernel(pt_ref, p_ref, out_ref):
    """Single invocation, whole batch, both heads fused.

    pt_ref  : (KC+1, B*HW) im2col patches transposed (lane-dense) + ones row
    p_ref   : (2F+2, KC+1) packed parameter slab:
                rows 0..2F-1              fused conv weights with bias column
                rows 2F..2F+1, cols 0..2F-1  head weights^T, pre-scaled by 1/HW
                rows 2F..2F+1, col  2F       head biases
    out_ref : (2, B) transposed output (row 0 = crack, row 1 = inactive)
    """
    # Both heads' 3x3 convs (bias included via the ones row) as ONE canonical
    # MXU matmul; activations come out lane-dense: (2F, B*HW) = (16, 512).
    h = jnp.dot(p_ref[0:F2, :], pt_ref[...], preferred_element_type=jnp.float32)
    h = jnp.maximum(h, 0.0)                                        # ReLU (VPU)

    # Global average pool per batch element: lane-segment sums on the XLU.
    # Segments are lane-tile aligned (HW = 256); 1/HW is folded into the packed
    # head weights, so only raw sums are needed here.
    sums = [jnp.sum(h[:, b * HW:(b + 1) * HW], axis=1, keepdims=True)
            for b in range(B)]                                     # B x (2F, 1)
    pooled_t = jnp.concatenate(sums, axis=1)                       # (2F, B)

    hw_t = p_ref[F2:F2 + 2, 0:F2]                                  # (2, 2F)
    hb = p_ref[F2:F2 + 2, F2:F2 + 1]                               # (2, 1)
    # Block-diagonal linear heads, canonical MXU matmul, single tiny store.
    out_ref[...] = (jnp.dot(hw_t, pooled_t,
                            preferred_element_type=jnp.float32) + hb)


def pack_params(params):
    """Fuse + pack all parameter-derived constants into one (2F+2, KC+1) slab."""
    pc, pi = params["crack"], params["inactive"]
    # Fused conv weights for both heads, bias column appended (ones-row trick).
    w_fused = jnp.concatenate([pc["conv_w"].reshape(KC, F),
                               pi["conv_w"].reshape(KC, F)], axis=1)   # (KC, 2F)
    b_fused = jnp.concatenate([pc["conv_b"], pi["conv_b"]],
                              axis=1).reshape(F2, 1)                   # (2F, 1)
    wt_aug = jnp.concatenate([w_fused.T, b_fused], axis=1)             # (2F, KC+1)
    # Block-diagonal head weights (transposed), with the 1/HW pooling scale folded in.
    zf = jnp.zeros((1, F), jnp.float32)
    hw_t = jnp.concatenate(
        [jnp.concatenate([pc["lin_w"].T, zf], axis=1),
         jnp.concatenate([zf, pi["lin_w"].T], axis=1)], axis=0) / HW   # (2, 2F)
    hb = jnp.concatenate([pc["lin_b"], pi["lin_b"]], axis=0)           # (2, 1)
    head_rows = jnp.concatenate(
        [hw_t, hb, jnp.zeros((2, KC1 - F2 - 1), jnp.float32)], axis=1)  # (2, KC+1)
    return jnp.concatenate([wt_aug, head_rows], axis=0)                 # (2F+2, KC+1)


def build_forward(params):
    """Returns a jitted forward(x) -> (B, 2); all param fusion hoisted out."""
    packed = pack_params(params)          # computed once, param-dependent only

    @jax.jit
    def forward(x_nchw):
        x = jnp.transpose(x_nchw, (0, 2, 3, 1)).astype(jnp.float32)     # NHWC
        # im2col (fused under this jit): pad=1, 3x3 patches, transposed so the
        # kernel's conv matmul produces lane-dense (2F, B*HW) activations.
        # TODO(synk): could build the patches in-kernel from the padded input to
        # skip the HBM materialization of pt; kept in the (jitted) wrapper since
        # the round-trip is ~150 KiB and off the critical path.
        xp = jnp.pad(x, ((0, 0), (1, 1), (1, 1), (0, 0)))
        patches = [xp[:, dy:dy + H, dx:dx + W, :]
                   for dy in range(KH) for dx in range(KW)]
        pt = jnp.stack(patches, axis=3).reshape(BHW, KC).T               # (KC, BHW)
        pt_aug = jnp.concatenate(
            [pt, jnp.ones((1, BHW), jnp.float32)], axis=0)               # (KC+1, BHW)

        # Gridless: every operand is a whole-array VMEM block (default specs);
        # total footprint ~80 KiB, no pipelining needed on any TPU generation.
        out_t = pl.pallas_call(
            _combined_kernel,
            out_shape=jax.ShapeDtypeStruct((2, B), jnp.float32),
        )(pt_aug, packed)
        return out_t.T                                                   # (B, 2)

    return forward


def reference(x_nchw, params):
    """Pure-JAX reference of the same forward (for verification)."""
    x = jnp.transpose(x_nchw, (0, 2, 3, 1)).astype(jnp.float32)

    def head(pp):
        y = lax.conv_general_dilated(x, pp["conv_w"], (1, 1), "SAME",
                                     dimension_numbers=("NHWC", "HWIO", "NHWC"))
        y = jax.nn.relu(y + pp["conv_b"].reshape(1, 1, 1, F))
        pooled = jnp.mean(y, axis=(1, 2))                 # (B, F)
        return pooled @ pp["lin_w"] + pp["lin_b"]         # (B, 1)

    return jnp.concatenate([head(params["crack"]), head(params["inactive"])],
                           axis=1)


def init_params(key):
    def head_params(k):
        k1, k2, k3, k4 = jax.random.split(k, 4)
        return dict(
            conv_w=jax.random.normal(k1, (KH, KW, C, F), jnp.float32) * 0.1,
            conv_b=jax.random.normal(k2, (1, F), jnp.float32) * 0.1,
            lin_w=jax.random.normal(k3, (F, 1), jnp.float32) * 0.1,
            lin_b=jax.random.normal(k4, (1, 1), jnp.float32) * 0.1,
        )
    kc, ki = jax.random.split(key)
    return dict(crack=head_params(kc), inactive=head_params(ki))


if __name__ == "__main__":
    key = jax.random.PRNGKey(0)
    kx, kp = jax.random.split(key)
    x = jax.random.normal(kx, (B, C, H, W), jnp.float32)
    params = init_params(kp)

    forward = build_forward(params)
    out = jax.block_until_ready(forward(x))

    ref = reference(x, params)
    assert out.shape == (B, 2), out.shape
    assert jnp.allclose(out, ref, atol=1e-4, rtol=1e-4), (out, ref)
    print("KERNEL_OK")
</pallas_src>

<mosaic_0001>
module attributes {stable_mosaic.version = 11 : i64} {
  func.func @_combined_kernel(%arg0: memref<37x512xf32, #tpu.memory_space<vmem>>, %arg1: memref<18x37xf32, #tpu.memory_space<vmem>>, %arg2: memref<2x2xf32, #tpu.memory_space<vmem>>) attributes {dimension_semantics = [], scalar_prefetch = 0 : i64, scratch_operands = 0 : i64, tpu.core_type = #tpu.core_type<tc>} {
    %c0 = arith.constant 0 : index
    %c0_0 = arith.constant 0 : index
    %0 = vector.load %arg1[%c0, %c0_0] : memref<18x37xf32, #tpu.memory_space<vmem>>, vector<16x37xf32>
    %c0_1 = arith.constant 0 : index
    %c0_2 = arith.constant 0 : index
    %1 = vector.load %arg0[%c0_1, %c0_2] : memref<37x512xf32, #tpu.memory_space<vmem>>, vector<37x512xf32>
    %cst = arith.constant dense<0.000000e+00> : vector<16x512xf32>
    %2 = tpu.matmul %0, %1, %cst {dimension_numbers = #tpu.dot_dimension_numbers<[1], [0], [0], [1], [0, 0, 1, 1], [], []>} : vector<16x37xf32>, vector<37x512xf32>, vector<16x512xf32> -> vector<16x512xf32>
    %cst_3 = arith.constant 0.000000e+00 : f32
    %3 = vector.broadcast %cst_3 : f32 to vector<16x512xf32>
    %4 = arith.maximumf %2, %3 : vector<16x512xf32>
    %5 = vector.extract_strided_slice %4 {offsets = [0, 0], sizes = [16, 256], strides = [1, 1]} : vector<16x512xf32> to vector<16x256xf32>
    %cst_4 = arith.constant dense<0.000000e+00> : vector<16xf32>
    %6 = vector.multi_reduction <add>, %5, %cst_4 [1] : vector<16x256xf32> to vector<16xf32>
    %7 = vector.shape_cast %6 : vector<16xf32> to vector<16x1xf32>
    %8 = vector.extract_strided_slice %4 {offsets = [0, 256], sizes = [16, 256], strides = [1, 1]} : vector<16x512xf32> to vector<16x256xf32>
    %cst_5 = arith.constant dense<0.000000e+00> : vector<16xf32>
    %9 = vector.multi_reduction <add>, %8, %cst_5 [1] : vector<16x256xf32> to vector<16xf32>
    %10 = vector.shape_cast %9 : vector<16xf32> to vector<16x1xf32>
    %11 = tpu.concatenate %7, %10 in 1 : vector<16x1xf32>, vector<16x1xf32> -> vector<16x2xf32>
    %c16 = arith.constant 16 : index
    %c0_6 = arith.constant 0 : index
    %12 = vector.load %arg1[%c16, %c0_6] : memref<18x37xf32, #tpu.memory_space<vmem>>, vector<2x16xf32>
    %c16_7 = arith.constant 16 : index
    %c16_8 = arith.constant 16 : index
    %13 = vector.load %arg1[%c16_7, %c16_8] : memref<18x37xf32, #tpu.memory_space<vmem>>, vector<2x1xf32>
    %cst_9 = arith.constant dense<0.000000e+00> : vector<2x2xf32>
    %14 = tpu.matmul %12, %11, %cst_9 {dimension_numbers = #tpu.dot_dimension_numbers<[1], [0], [0], [1], [0, 0, 1, 1], [], []>} : vector<2x16xf32>, vector<16x2xf32>, vector<2x2xf32> -> vector<2x2xf32>
    %15 = vector.broadcast %13 : vector<2x1xf32> to vector<2x2xf32>
    %16 = arith.addf %14, %15 : vector<2x2xf32>
    %c0_10 = arith.constant 0 : index
    %c0_11 = arith.constant 0 : index
    %17 = vector.load %arg2[%c0_10, %c0_11] : memref<2x2xf32, #tpu.memory_space<vmem>>, vector<2x2xf32>
    tpu.vector_store %arg2[%c0_10, %c0_11], %16 {strides = array<i32>} : memref<2x2xf32, #tpu.memory_space<vmem>>, vector<2x2xf32>,
    return
  }
}

</mosaic_0001>

<bundles_post_ra>
// kernel: forward.1
= control target key start
LH: loop header
LB: loop body
LE: loop exit
PB: predicated region body
PF: predicated region fallthrough
CT: control target
= control target key end

     0   :  { %v358_v3 = vmov 0.0   ;;  %vm40_vm0 = vcmask 1044480   ;;  %vm33_vm1 = vcmask 302080   ;;  %v359_v51 = vmov 0.0|0.0   ;;  %s454_s0 = inlined_call_operand.vmem [shape: f32[37,512], index: 0, kind: input, shape index: {}]   ;;  %s455_s1 = inlined_call_operand.vmem [shape: f32[18,37], index: 1, kind: input, shape index: {}]   ;;  %s456_s2 = inlined_call_operand.vmem [shape: f32[2,2], index: 2, kind: output, shape index: {}]  }
   0x1   :  { %v14_v0 = vld [vmem:[%s454_s0 + $0x8] sm:$0xff]  ;;  %v16_v2 = vld [vmem:[%s454_s0 + $0x18] sm:$0xff]  ;;  %117 = vmatprep.mubr.f32.mxu0 %v358_v3  ;;  %194 = vmatprep.mubr.f32.mxu1 %v358_v3  ;;  %v13_v6 = vld [vmem:[%s454_s0] sm:$0xff]  ;;  %vm360_vm2 = vmmov 0   ;;  %v361_v53 = vmov 16   ;;  %vm227_vm3 = vcmask 7168  }
   0x2   :  { %v18_v1 = vld [vmem:[%s454_s0 + $0x28] sm:$0xff]  ;;  %v20_v5 = vld [vmem:[%s454_s0 + $0x38] sm:$0xff]  ;;  %v17_v7 = vld [vmem:[%s454_s0 + $0x20] sm:$0xff]  ;;  %357 = vset.pattern.permute.xlu0 %v361_v53  ;;  %vm236_vm4 = vcmask 130048   ;;  %vm309_vm5 = vcmask 9216  }
   0x3   :  { %v334_v4 = vpack.c.bf16 %v18_v1, %v14_v0  ;;  %v342_v8 = vpack.c.bf16 %v20_v5, %v16_v2  ;;  %v336_v9 = vpack.c.bf16 %v17_v7, %v13_v6  ;;  %v15_v10 = vld [vmem:[%s454_s0 + $0x10] sm:$0xff]  ;;  %v22_v12 = vld [vmem:[%s454_s0 + $0x48] sm:$0xff]  ;;  %v24_v15 = vld [vmem:[%s454_s0 + $0x58] sm:$0xff] }
   0x4   :  { %v19_v11 = vld [vmem:[%s454_s0 + $0x30] sm:$0xff]  ;;  %v26_v14 = vld [vmem:[%s454_s0 + $0x68] sm:$0xff]  ;;  %v28_v16 = vld [vmem:[%s454_s0 + $0x78] sm:$0xff] }
   0x5   :  { %335 = vmatprep.subr.bf16.mxu0 %v334_v4  ;;  %v344_v13 = vpack.c.bf16 %v19_v11, %v15_v10  ;;  %343 = vmatprep.subr.bf16.mxu1 %v342_v8  ;;  %v338_v17 = vpack.c.bf16 %v26_v14, %v22_v12  ;;  %v346_v18 = vpack.c.bf16 %v28_v16, %v24_v15  ;;  %v21_v19 = vld [vmem:[%s454_s0 + $0x40] sm:$0xff]  ;;  %v23_v21 = vld [vmem:[%s454_s0 + $0x50] sm:$0xff]  ;;  %v30_v25 = vld [vmem:[%s454_s0 + $0x88] sm:$0x1f] }
   0x6   :  { %337 = vmatpush1.bf16.msra.mxu0 %v336_v9  ;;  %v25_v20 = vld [vmem:[%s454_s0 + $0x60] sm:$0xff]  ;;  %v27_v23 = vld [vmem:[%s454_s0 + $0x70] sm:$0xff]  ;;  %v32_v26 = vld [vmem:[%s454_s0 + $0x98] sm:$0x1f] }
   0x7   :  { %345 = vmatpush1.bf16.msra.mxu1 %v344_v13  ;;  %v340_v22 = vpack.c.bf16 %v25_v20, %v21_v19  ;;  %339 = vmatprep.subr.bf16.mxu0 %v338_v17  ;;  %v348_v24 = vpack.c.bf16 %v27_v23, %v23_v21  ;;  %v29_v27 = vld [vmem:[%s454_s0 + $0x80] sm:$0x1f]  ;;  %v31_v28 = vld [vmem:[%s454_s0 + $0x90] sm:$0x1f]  ;;  %v12_v30 = vld [vmem:[%s455_s1 + $0x8] sm:$0xff] }
   0x8   :  { %347 = vmatprep.subr.bf16.mxu1 %v346_v18  ;;  %v11_v29 = vld [vmem:[%s455_s1] sm:$0xff]  ;;  %v230_v52 = vld [vmem:[%s455_s1 + $0x10] sm:$0x3] }
   0xa   :  { %341 = vmatpush1.bf16.msra.mxu0 %v340_v22 }
   0xb   :  { %349 = vmatpush1.bf16.msra.mxu1 %v348_v24  ;;  %315 = vmatprep.subr.msk.mxu0 %vm40_vm0, %v30_v25 }
   0xc   :  { %319 = vmatprep.subr.msk.mxu1 %vm40_vm0, %v32_v26 }
   0xe   :  { %316 = vmatpush1.msk.msra.mxu0 %vm40_vm0, %v29_v27 }
   0xf   :  { %320 = vmatpush1.msk.msra.mxu1 %vm40_vm0, %v31_v28  ;;  %317 = vmatmul.mubr.msk.f32.vlgmr.msra.gmra.mrb[0].mxu0 %vm33_vm1, %v11_v29 }
  0x10   :  { %321 = vmatmul.mubr.msk.f32.vlgmr.msra.gmra.mrb[0].mxu1 %vm33_vm1, %v11_v29  ;;  %123 = vmatprep.mubr.f32.mxu0 %v358_v3 }
  0x11   :  { %200 = vmatprep.mubr.f32.mxu1 %v358_v3  ;;  %350 = vmatprep.subr.bf16.mxu0 %v359_v51 }
  0x13   :  { %318 = vmatmul.mubr.msk.f32.gmra.mrb[2].mxu0 %vm33_vm1, %v12_v30 }
  0x14   :  { %322 = vmatmul.mubr.msk.f32.gmra.mrb[2].mxu1 %vm33_vm1, %v12_v30  ;;  %331 = vmatprep.mubr.msk.f32.mxu0 %vm360_vm2, %v358_v3 }
  0xe2   :  { %v119_v31 = vpop.f32.mrb[0].mxu0 }
  0xe3   :  { %v207_v32 = vmax.f32 %v119_v31, 0.0  ;;  %v196_v33 = vpop.f32.mrb[0].mxu1  ;;  %v121_v34 = vpop.f32.mrb[1].mxu0 }
  0xe4   :  { %v209_v35 = vmax.f32 %v196_v33, 0.0  ;;  %v208_v36 = vmax.f32 %v121_v34, 0.0  ;;  %v198_v37 = vpop.f32.mrb[1].mxu1 }
  0xe5   :  { %v210_v38 = vmax.f32 %v198_v37, 0.0 }
  0xe6   :  { %v125_v39 = vpop.f32.mrb[2].mxu0  ;;  %v215_v40 = vadd.f32 %v208_v36, %v207_v32 }
  0xe7   :  { %v211_v41 = vmax.f32 %v125_v39, 0.0  ;;  %v202_v42 = vpop.f32.mrb[2].mxu1  ;;  %v127_v43 = vpop.f32.mrb[3].mxu0  ;;  %v221_v44 = vadd.f32 %v210_v38, %v209_v35 }
  0xe8   :  { %v213_v45 = vmax.f32 %v202_v42, 0.0  ;;  %v212_v46 = vmax.f32 %v127_v43, 0.0  ;;  %v204_v47 = vpop.f32.mrb[3].mxu1  ;;  %216 = vadd.xlane.f32.xlu0 %v215_v40 }
  0xe9   :  { %v214_v48 = vmax.f32 %v204_v47, 0.0  ;;  %222 = vadd.xlane.f32.xlu1 %v221_v44 }
  0xea   :  { %v218_v49 = vadd.f32 %v212_v46, %v211_v41 }
  0xeb   :  { %v224_v50 = vadd.f32 %v214_v48, %v213_v45 }
  0xec   :  { %219 = vadd.xlane.f32.xlu0 %v218_v49 }
  0xed   :  { %225 = vadd.xlane.f32.xlu1 %v224_v50 }
 0x102   :  { %233 = vperm.xlu0 %357, %v230_v52  }
 0x175   :  { %v217_v54 = vpop.xlane.xlu0 %216 }
 0x176   :  { %v223_v55 = vpop.xlane.xlu1 %222 }
 0x177   :  { %v228_v58 = vsel %vm227_vm3, %v217_v54, %v223_v55 }
 0x179   :  { %v220_v56 = vpop.xlane.xlu0 %219 }
 0x17a   :  { %v226_v57 = vpop.xlane.xlu1 %225 }
 0x17b   :  { %v229_v59 = vsel %vm227_vm3, %v220_v56, %v226_v57 }
 0x17c   :  { %v351_v60 = vpack.c.bf16 %v229_v59, %v228_v58 }
 0x17e   :  { %352 = vmatpush3.bf16.msra.mxu0 %v351_v60 }
 0x181   :  { %332 = vmatmul.mubr.msk.f32.vlgmr.msra.gmra.mrb[4].mxu0 %vm236_vm4, %v230_v52  ;;  %v234_v61 = vpop.permute.xlu0 %233 }
 0x254   :  { %v305_v62 = vpop.f32.mrb[4].mxu0 }
 0x255   :  { %v333_v63 = vpop.f32.mrb[5].mxu0  ;;  %v306_v0 = vadd.f32 %v305_v62, %v234_v61 }
 0x257   :  { %310 = vst.msk [vmem:[%s456_s2] sm:$0x3] %vm309_vm5, %v306_v0 }

</bundles_post_ra>
